<compile_context>
chip_gen: v7x
topology: tpu7x:2x2x1
jax: 0.10.0
libtpu: 0.0.40
codegen_flags: <defaults>
</compile_context>

<pallas_src>
import functools

import jax
import jax.numpy as jnp
from jax.experimental import pallas as pl
from jax.experimental.pallas import tpu as pltpu


def _round_up(x, m):
    return ((x + m - 1) // m) * m


def _choose_tm(m):
    # Single M tile for small/medium batches (block dim only needs %8 or
    # full-dim); otherwise 512/256/128, preferring an exact divisor of M.
    if m <= 1024:
        return _round_up(m, 8)
    for t in (512, 256, 128):
        if m % t == 0:
            return t
    return 512


def _choose_tile(dim, prefs, align):
    for p in prefs:
        if dim >= p and dim % p == 0:
            return p
    if dim >= prefs[0]:
        return prefs[0]
    return _round_up(dim, align)


def _vmem_limit_bytes():
    # Generation-aware scoped-VMEM limit: ~3/4 of physical VMEM, capped.
    # v5e/v6e (128 MiB) -> 96 MiB; v7x (64 MiB) -> 48 MiB.
    try:
        cap = int(pltpu.get_tpu_info().vmem_capacity_bytes)
    except Exception:
        cap = 64 * 1024 * 1024  # assume the most restrictive generation (v7x)
    return max(32 * 1024 * 1024, min((cap * 3) // 4, 100 * 1024 * 1024))


# ----------------------------- kernels -------------------------------------


def _linear_small_kernel(x_ref, w_ref, b_ref, o_ref):
    # Whole weight in one tile: (tm,K) @ (K,N) + (1,N); no K-reduction loop.
    o_ref[...] = (
        jnp.dot(x_ref[...], w_ref[...], preferred_element_type=jnp.float32)
        + b_ref[...]
    ).astype(o_ref.dtype)


def _linear_kernel(x_ref, w_ref, b_ref, o_ref):
    # General tiled path. K is the innermost ("arbitrary") grid axis, so the
    # output block index is constant across it and o_ref (f32) stays resident
    # in VMEM: it is used directly as the accumulator (no scratch), with the
    # bias folded into the k==0 init.
    # NOTE: correctness relies on K remaining the innermost grid axis.
    @pl.when(pl.program_id(2) == 0)
    def _():
        o_ref[...] = jnp.broadcast_to(b_ref[...], o_ref.shape).astype(o_ref.dtype)

    o_ref[...] += jnp.dot(
        x_ref[...], w_ref[...], preferred_element_type=jnp.float32
    )


# --------------------------- pallas_call wrappers ---------------------------


def _fwd_single_tile(x, w_t, b_row, *, vmem_limit):
    M, K = x.shape
    _, N = w_t.shape
    tm = _choose_tm(M)
    M_pad = _round_up(M, tm)
    if M_pad != M:
        x = jnp.pad(x, ((0, M_pad - M), (0, 0)))
    grid = (M_pad // tm,)
    out = pl.pallas_call(
        _linear_small_kernel,
        out_shape=jax.ShapeDtypeStruct((M_pad, N), jnp.float32),
        grid_spec=pltpu.PrefetchScalarGridSpec(
            num_scalar_prefetch=0,
            grid=grid,
            in_specs=[
                pl.BlockSpec((tm, K), lambda i: (i, 0)),  # x M-tile
                pl.BlockSpec((K, N), lambda i: (0, 0)),   # full weight (resident)
                pl.BlockSpec((1, N), lambda i: (0, 0)),   # bias row
            ],
            out_specs=pl.BlockSpec((tm, N), lambda i: (i, 0)),
        ),
        compiler_params=pltpu.CompilerParams(
            dimension_semantics=("parallel",),
            vmem_limit_bytes=vmem_limit,
        ),
        cost_estimate=pl.CostEstimate(
            flops=2 * M_pad * N * K,
            transcendentals=0,
            bytes_accessed=4 * (M_pad * K + K * N + M_pad * N + N),
        ),
    )(x, w_t, b_row)
    return out[:M] if M_pad != M else out


def _fwd_tiled(x, w_t, b_row, *, tn, tk, n_out, vmem_limit):
    M, K = x.shape
    K_pad, N_pad = w_t.shape
    tm = _choose_tm(M)
    M_pad = _round_up(M, tm)
    if M_pad != M or K_pad != K:
        x = jnp.pad(x, ((0, M_pad - M), (0, K_pad - K)))
    grid = (M_pad // tm, N_pad // tn, K_pad // tk)
    out = pl.pallas_call(
        _linear_kernel,
        out_shape=jax.ShapeDtypeStruct((M_pad, N_pad), jnp.float32),
        grid_spec=pltpu.PrefetchScalarGridSpec(
            num_scalar_prefetch=0,
            grid=grid,
            in_specs=[
                pl.BlockSpec((tm, tk), lambda i, j, k: (i, k)),  # x tile
                pl.BlockSpec((tk, tn), lambda i, j, k: (k, j)),  # W^T tile (K,N)
                pl.BlockSpec((1, tn), lambda i, j, k: (0, j)),   # bias tile
            ],
            out_specs=pl.BlockSpec((tm, tn), lambda i, j, k: (i, j)),
        ),
        compiler_params=pltpu.CompilerParams(
            dimension_semantics=("parallel", "parallel", "arbitrary"),
            vmem_limit_bytes=vmem_limit,
        ),
        cost_estimate=pl.CostEstimate(
            flops=2 * M_pad * N_pad * K_pad,
            transcendentals=0,
            # Include re-streaming: W is read once per M tile, x once per N tile.
            bytes_accessed=4 * (
                M_pad * K_pad * (N_pad // tn)
                + K_pad * N_pad * (M_pad // tm)
                + M_pad * N_pad
                + N_pad
            ),
        ),
    )(x, w_t, b_row)
    if M_pad != M or N_pad != n_out:
        out = out[:M, :n_out]
    return out


def make_linear(w, b):
    """Build y = x @ w.T + b (PyTorch nn.Linear semantics).

    w: (out_features, in_features) PyTorch layout; b: (out_features,).
    The weight is transposed (and padded, if needed) exactly ONCE here and
    cached, so per-call HBM traffic only touches x and the output.
    Returns a jitted callable fwd(x) with x: (batch, in_features).
    """
    w = jnp.asarray(w, jnp.float32)
    b = jnp.asarray(b, jnp.float32)
    N, K = w.shape
    assert b.shape == (N,)
    vmem_limit = _vmem_limit_bytes()

    if N <= 512 and K <= 1024:
        # Whole weight fits one tile: no K-reduction grid, no padding at all.
        w_t = jnp.transpose(w)  # (K, N), one-time transpose
        b_row = b.reshape(1, N)
        call = jax.jit(functools.partial(_fwd_single_tile, vmem_limit=vmem_limit))
    else:
        tn = _choose_tile(N, (512, 256, 128), 128)
        tk = _choose_tile(K, (1024, 512, 256, 128), 128)
        N_pad = _round_up(N, tn)
        K_pad = _round_up(K, tk)
        w_t = jnp.transpose(w)  # (K, N), one-time transpose
        if N_pad != N or K_pad != K:  # one-time pad of the cached parameter
            w_t = jnp.pad(w_t, ((0, K_pad - K), (0, N_pad - N)))
        b_row = (jnp.pad(b, (0, N_pad - N)) if N_pad != N else b).reshape(1, N_pad)
        call = jax.jit(functools.partial(
            _fwd_tiled, tn=tn, tk=tk, n_out=N, vmem_limit=vmem_limit))

    w_t = jax.device_put(w_t)
    b_row = jax.device_put(b_row)

    def fwd(x):
        return call(x, w_t, b_row)

    return fwd


if __name__ == "__main__":
    key = jax.random.PRNGKey(0)
    k_x, k_w, k_b = jax.random.split(key, 3)

    # Shapes implied by dummy(inp) with a small batch.
    batch, inp = 8, 32
    x = jax.random.normal(k_x, (batch, inp), dtype=jnp.float32)
    # Deterministic "init" of nn.Linear(inp, inp) parameters (PyTorch layout).
    w = jax.random.normal(k_w, (inp, inp), dtype=jnp.float32) * (1.0 / jnp.sqrt(inp))
    b = jax.random.normal(k_b, (inp,), dtype=jnp.float32) * 0.01

    fwd = make_linear(w, b)  # dummy.forward(x) == self.l1(x)
    y = fwd(x)
    jax.block_until_ready(y)

    y_ref = x @ w.T + b
    assert jnp.allclose(y, y_ref, atol=1e-5, rtol=1e-5), "single-tile path mismatch"

    # Secondary check: exercise the general tiled (K-reduction) path.
    k_x2, k_w2, k_b2 = jax.random.split(jax.random.PRNGKey(1), 3)
    batch2, inp2 = 64, 2048
    x2 = jax.random.normal(k_x2, (batch2, inp2), dtype=jnp.float32)
    w2 = jax.random.normal(k_w2, (inp2, inp2), dtype=jnp.float32) * (1.0 / jnp.sqrt(inp2))
    b2 = jax.random.normal(k_b2, (inp2,), dtype=jnp.float32) * 0.01
    y2 = make_linear(w2, b2)(x2)
    jax.block_until_ready(y2)
    y2_ref = x2 @ w2.T + b2
    # Loose tolerance: default-precision f32 matmul accumulation over K=2048.
    assert jnp.allclose(y2, y2_ref, atol=5e-2, rtol=5e-2), "tiled path mismatch"

    print("KERNEL_OK")
</pallas_src>

<mosaic_0001>
module attributes {stable_mosaic.version = 11 : i64} {
  func.func @_linear_small_kernel(%arg0: i32, %arg1: memref<8x32xf32, #tpu.memory_space<vmem>>, %arg2: memref<32x32xf32, #tpu.memory_space<vmem>>, %arg3: memref<1x32xf32, #tpu.memory_space<vmem>>, %arg4: memref<8x32xf32, #tpu.memory_space<vmem>>) attributes {dimension_semantics = [#tpu.dimension_semantics<parallel>], iteration_bounds = array<i64: 1>, scalar_prefetch = 0 : i64, scratch_operands = 0 : i64, tpu.core_type = #tpu.core_type<tc>, window_params = [{transform_indices = @transform_0, window_bounds = array<i64: 8, 32>}, {pipeline_mode = #tpu.pipeline_mode<synchronous>, transform_indices = @transform_1, window_bounds = array<i64: 32, 32>}, {pipeline_mode = #tpu.pipeline_mode<synchronous>, transform_indices = @transform_2, window_bounds = array<i64: 1, 32>}, {transform_indices = @transform_3, window_bounds = array<i64: 8, 32>}]} {
    %c0 = arith.constant 0 : index
    %c0_0 = arith.constant 0 : index
    %0 = vector.load %arg1[%c0, %c0_0] : memref<8x32xf32, #tpu.memory_space<vmem>>, vector<8x32xf32>
    %c0_1 = arith.constant 0 : index
    %c0_2 = arith.constant 0 : index
    %1 = vector.load %arg2[%c0_1, %c0_2] : memref<32x32xf32, #tpu.memory_space<vmem>>, vector<32x32xf32>
    %cst = arith.constant dense<0.000000e+00> : vector<8x32xf32>
    %2 = tpu.matmul %0, %1, %cst {dimension_numbers = #tpu.dot_dimension_numbers<[1], [0], [0], [1], [0, 0, 1, 1], [], []>} : vector<8x32xf32>, vector<32x32xf32>, vector<8x32xf32> -> vector<8x32xf32>
    %c0_3 = arith.constant 0 : index
    %c0_4 = arith.constant 0 : index
    %3 = vector.load %arg3[%c0_3, %c0_4] : memref<1x32xf32, #tpu.memory_space<vmem>>, vector<1x32xf32>
    %4 = vector.broadcast %3 : vector<1x32xf32> to vector<8x32xf32>
    %5 = arith.addf %2, %4 : vector<8x32xf32>
    %c0_5 = arith.constant 0 : index
    %c0_6 = arith.constant 0 : index
    %6 = vector.load %arg4[%c0_5, %c0_6] : memref<8x32xf32, #tpu.memory_space<vmem>>, vector<8x32xf32>
    tpu.vector_store %arg4[%c0_5, %c0_6], %5 {strides = array<i32>} : memref<8x32xf32, #tpu.memory_space<vmem>>, vector<8x32xf32>,
    return
  }
  func.func @transform_0(%arg0: i32) -> (i32, i32) {
    %c0_i32 = arith.constant 0 : i32
    %c0_i32_0 = arith.constant 0 : i32
    return %arg0, %c0_i32 : i32, i32
  }
  func.func @transform_1(%arg0: i32) -> (i32, i32) {
    %c0_i32 = arith.constant 0 : i32
    %c0_i32_0 = arith.constant 0 : i32
    %c0_i32_1 = arith.constant 0 : i32
    return %c0_i32, %c0_i32_0 : i32, i32
  }
  func.func @transform_2(%arg0: i32) -> (i32, i32) {
    %c0_i32 = arith.constant 0 : i32
    %c0_i32_0 = arith.constant 0 : i32
    %c0_i32_1 = arith.constant 0 : i32
    return %c0_i32, %c0_i32_0 : i32, i32
  }
  func.func @transform_3(%arg0: i32) -> (i32, i32) {
    %c0_i32 = arith.constant 0 : i32
    %c0_i32_0 = arith.constant 0 : i32
    return %arg0, %c0_i32 : i32, i32
  }
}

</mosaic_0001>

<bundles_post_ra>
// kernel: _fwd_single_tile.1
= control target key start
LH: loop header
LB: loop body
LE: loop exit
PB: predicated region body
PF: predicated region fallthrough
CT: control target
= control target key end

     0   :  { %8 = vsyncpa [#allocation3], 0  ;;  %s322_s0 = inlined_call_operand.hbm [shape: f32[8,32], index: 0, kind: input, shape index: {}]   ;;  %s323_s1 = inlined_call_operand.hbm [shape: f32[32,32], index: 1, kind: input, shape index: {}]   ;;  %s324_s2 = inlined_call_operand.vmem [shape: f32[1,32], index: 2, kind: input, shape index: {}]   ;;  %s325_s3 = inlined_call_operand.hbm [shape: f32[8,32], index: 3, kind: output, shape index: {}]  }
   0x1   :  { %9 = vsyncpa [#allocation6], 0 }
   0x2   :  { %10 = vsyncpa [#allocation4], 0  ;;  %s248_s12 = smov [#allocation2]   ;;  %s249_s14 = smov [#allocation5]  }
   0x3   :  { %s17_s13 = sshll.u32 %s248_s12, 4  ;;  %s26_s15 = sshll.u32 %s249_s14, 4  ;;  %s18_s13 = int_to_ptr.vmem [resolvable:$true] %s17_s13  ;;  %s276_s15 = int_to_ptr.vmem [resolvable:$true] %s26_s15 }
   0x4   :  { %s176_s18 = scalar_lea.hbm %s322_s0, 128 }
   0x5   :  { %p177_p0 = scmp.ne.s32.totalorder %s322_s0, %s176_s18  ;;  %p180_p1 = scmp.lt.u32.totalorder %s176_s18, %s322_s0 }
   0x7   :  { %p182_p2 = pnand %p180_p1, %p177_p0 }
   0x9   :  { %185 = shalt.err (!%p182_p2)
}
   0xa   :  { %s186_s23 = scalar_lea.vmem %s18_s13, 128  ;;  %p191_p4 = scmp.lt.s32.totalorder %s18_s13, %s18_s13 }
   0xb   :  { %p187_p3 = scmp.ne.s32.totalorder %s18_s13, %s186_s23  ;;  %p192_p5 = scmp.lt.s32.totalorder %s186_s23, %s186_s23 }
   0xd   :  { %p193_p6 = por %p192_p5, %p191_p4 }
   0xf   :  { %p194_p7 = pnand %p193_p6, %p187_p3 }
  0x11   :  { %197 = shalt.err (!%p194_p7)
}
  0x12   :  { %20 = dma.hbm_to_vmem [thread:$0]  %s322_s0, 128, %s18_s13, [#allocation3]  }
  0x13   :  { %s198_s28 = scalar_lea.hbm %s323_s1, 512 }
  0x14   :  { %p199_p8 = scmp.ne.s32.totalorder %s323_s1, %s198_s28  ;;  %p202_p9 = scmp.lt.u32.totalorder %s198_s28, %s323_s1 }
  0x16   :  { %p204_p10 = pnand %p202_p9, %p199_p8 }
  0x18   :  { %207 = shalt.err (!%p204_p10)
}
  0x19   :  { %s208_s6 = scalar_lea.vmem %s276_s15, 512  ;;  %p213_p12 = scmp.lt.s32.totalorder %s276_s15, %s276_s15 }
  0x1a   :  { %p209_p11 = scmp.ne.s32.totalorder %s276_s15, %s208_s6  ;;  %p214_p13 = scmp.lt.s32.totalorder %s208_s6, %s208_s6 }
  0x1c   :  { %p215_p0 = por %p214_p13, %p213_p12 }
  0x1e   :  { %p216_p1 = pnand %p215_p0, %p209_p11 }
  0x20   :  { %219 = shalt.err (!%p216_p1)
}
  0x21   :  { %s250_s0 = smov 128   ;;  %s251_s7 = smov 8  }
  0x22   :  { %32 = dma.hbm_to_vmem [thread:$0]  %s323_s1, 512, %s276_s15, [#allocation6], %s250_s0, %s250_s0, %s251_s7  }
  0x23   :  { %242 = dma.done.wait [#allocation3], 128  }
  0x24   :  { %243 = vsyncadd [#allocation3], 4294967168 }
  0x25   :  { %244 = dma.done.wait [#allocation6], 512  }
  0x26   :  { %245 = vsyncadd [#allocation6], 4294966784  ;;  %v252_v0 = vmov 0.0|0.0   ;;  %vm253_vm0 = vmmov 0   ;;  %v254_v1 = vmov 0.0   ;;  %v42_v2 = vld [vmem:[#allocation5] sm:$0xff] }
  0x27   :  { %162 = vmatprep.subr.bf16.mxu0 %v252_v0  ;;  %159 = vmatprep.mubr.msk.f32.mxu0 %vm253_vm0, %v254_v1  ;;  %v43_v3 = vld [vmem:[#allocation5 + $0x8] sm:$0xff]  ;;  %v44_v4 = vld [vmem:[#allocation5 + $0x10] sm:$0xff]  ;;  %v45_v6 = vld [vmem:[#allocation5 + $0x18] sm:$0xff]  ;;  %vm53_vm1 = vcmask 261120   ;;  %s255_s11 = smov [#allocation7]  }
  0x28   :  { %v163_v5 = vpack.c.bf16 %v43_v3, %v42_v2  ;;  %v166_v7 = vpack.c.bf16 %v45_v6, %v44_v4  ;;  %v41_v8 = vld [vmem:[#allocation2] sm:$0xff]  ;;  %s134_s12 = sshll.u32 %s255_s11, 4  ;;  %s135_s12 = int_to_ptr.vmem [resolvable:$true] %s134_s12 }
  0x29   :  { %v144_v9 = vld [vmem:[%s324_s2] ss:$0 sm:$0xff]  ;;  %s220_s13 = scalar_lea.vmem %s135_s12, 128  ;;  %p225_p3 = scmp.lt.s32.totalorder %s135_s12, %s135_s12 }
  0x2a   :  { %164 = vmatpush3.bf16.msra.mxu0 %v163_v5  ;;  %p221_p2 = scmp.ne.s32.totalorder %s135_s12, %s220_s13  ;;  %p226_p4 = scmp.lt.s32.totalorder %s220_s13, %s220_s13 }
  0x2b   :  { %165 = vmatprep.subr.bf16.mxu0 %v252_v0 }
  0x2c   :  { %p227_p5 = por %p226_p4, %p225_p3 }
  0x2e   :  { %167 = vmatpush3.bf16.msra.mxu0 %v166_v7  ;;  %p228_p6 = pnand %p227_p5, %p221_p2 }
  0x31   :  { %160 = vmatmul.mubr.msk.f32.vlgmr.msra.gmra.mrb[0].mxu0 %vm53_vm1, %v41_v8 }
 0x104   :  { %v123_v10 = vpop.f32.mrb[0].mxu0 }
 0x105   :  { %v124_v11 = vadd.f32 %v144_v9, %v123_v10  ;;  %v161_v12 = vpop.f32.mrb[1].mxu0 }
 0x107   :  { %127 = vst.msk [vmem:[#allocation7] sm:$0xff] %vm53_vm1, %v124_v11 }
 0x108   :  { %231 = shalt.err (!%p228_p6)
}
 0x109   :  { %s232_s16 = scalar_lea.hbm %s325_s3, 128 }
 0x10a   :  { %p233_p7 = scmp.ne.s32.totalorder %s325_s3, %s232_s16  ;;  %p236_p8 = scmp.lt.u32.totalorder %s232_s16, %s325_s3 }
 0x10c   :  { %p238_p9 = pnand %p236_p8, %p233_p7 }
 0x10e   :  { %241 = shalt.err (!%p238_p9)
}
 0x10f   :  { %137 = dma.vmem_to_hbm [thread:$0]  %s135_s12, 128, %s325_s3, [#allocation4]  }
 0x110   :  { %246 = dma.done.wait [#allocation4], 128  }
 0x111   :  { %247 = vsyncadd [#allocation4], 4294967168 }
 0x112   :  { %141 = vsyncpa [#allocation3], 1 }
 0x113   :  { %142 = vsyncpa [#allocation6], 1 }
 0x114   :  { %143 = vsyncpa [#allocation4], 1 }

</bundles_post_ra>
